<compile_context>
chip_gen: v5e
topology: v5e:2x2
jax: 0.10.0
libtpu: 0.0.40
codegen_flags: <defaults>
</compile_context>

<pallas_src>
import functools

import jax
import jax.numpy as jnp
from jax.experimental import pallas as pl
from jax.experimental.pallas import tpu as pltpu


NUM_CLASSES = 10
C_PAD = 16   # class dim padded to the bf16 sublane-packing minimum (16), not 128 lanes
TB = 256     # batch tile for the gridded (large-B) path


def _make_kernel(group_nbits, d):
    """Ensemble kernel for a static tuple of UNIQUE n_bits groups.

    Weights for members sharing an n_bits value are pre-summed (linearity), so
    the kernel contracts one xq per group against the group's summed weights.
    """
    group_nbits = tuple(int(n) for n in group_nbits)

    def kernel(x_ref, w_ref, b_ref, out_ref):
        # x_ref   : VMEM (TB, D)       f32  -- shared flattened input tile
        # w_ref   : VMEM (C_PAD, G*D)  bf16 -- per-group pre-summed classifiers, transposed
        # b_ref   : VMEM (1, C_PAD)    f32  -- biases pre-summed over members
        # out_ref : VMEM (TB, C_PAD)   f32  -- summed ensemble logits
        x = x_ref[...]                      # (TB, D) f32
        x_clip = jnp.clip(x, 0.0, 1.0)      # hoisted: computed once, reused by all groups

        acc = None
        for g, nb in enumerate(group_nbits):
            # Quantise2d in f32 (v5e VPU has no bf16 ALU; torch-identical
            # round-half-to-even), cast to bf16 only for the MXU feed.
            if nb <= 0:                     # FP member: identity (quantise=False)
                xq = x
            else:
                lv = float((1 << nb) - 1)
                xq = jnp.round(x_clip * lv) * (1.0 / lv)
            xq = xq.astype(jnp.bfloat16)    # (TB, D) bf16, stays in vregs (no slab)

            wg = w_ref[:, g * d:(g + 1) * d]   # static ref slice -> (C_PAD, D) bf16
            partial = jax.lax.dot_general(
                xq, wg,
                (((1,), (1,)), ((), ())),
                preferred_element_type=jnp.float32)        # (TB, C_PAD) f32
            acc = partial if acc is None else acc + partial

        out_ref[...] = acc + b_ref[...]

    return kernel


def pack_ensemble_params(nbits, w_members_f32, biases_f32):
    """Group members by n_bits and pre-sum their weights (exact by linearity).

    Args:
      nbits:          tuple of ints, len M (0 => FP identity).
      w_members_f32:  (M, C_PAD, D) f32 per-member classifier weights.
      biases_f32:     (M, C_PAD)    f32 per-member biases.

    Returns:
      group_nbits: tuple of unique n_bits (first-occurrence order), len G.
      w_cat:       (C_PAD, G*D) bf16, group-major along K (weights summed within group, in f32).
      bias_sum:    (1, C_PAD) f32, summed over all members.
    """
    m, c_pad, d = w_members_f32.shape
    assert len(nbits) == m

    groups = {}
    order = []
    for mm, nb in enumerate(nbits):
        key = int(nb) if int(nb) > 0 else 0
        if key not in groups:
            groups[key] = []
            order.append(key)
        groups[key].append(mm)
    group_nbits = tuple(order)

    w_groups = []
    for key in order:
        w_sum = jnp.zeros((c_pad, d), jnp.float32)
        for mm in groups[key]:
            w_sum = w_sum + w_members_f32[mm]          # sum in f32
        w_groups.append(w_sum.astype(jnp.bfloat16))    # cast once, after summing
    w_cat = jnp.concatenate(w_groups, axis=1)          # (C_PAD, G*D) bf16

    bias_sum = biases_f32.sum(axis=0, keepdims=True).astype(jnp.float32)  # (1, C_PAD)
    return group_nbits, w_cat, bias_sum


@functools.partial(jax.jit, static_argnums=(1,))
def ensemble_forward(x_nchw, group_nbits, w_cat, bias_sum):
    """x_nchw: (B, C, H, W) f32; group_nbits: static tuple of unique n_bits (len G);
    w_cat: (C_PAD, G*D) bf16; bias_sum: (1, C_PAD) f32.  Returns (B, NUM_CLASSES) f32."""
    b = x_nchw.shape[0]
    c_pad, gd = w_cat.shape
    g = len(group_nbits)
    d = gd // g
    x_flat = x_nchw.reshape(b, -1).astype(jnp.float32)
    assert x_flat.shape[1] == d

    kernel = _make_kernel(group_nbits, d)

    if b <= TB:
        # Small batch: single gridless invocation, everything resident in VMEM.
        out_padded = pl.pallas_call(
            kernel,
            out_shape=jax.ShapeDtypeStruct((b, c_pad), jnp.float32),
            in_specs=[
                pl.BlockSpec(memory_space=pltpu.MemorySpace.VMEM),  # x
                pl.BlockSpec(memory_space=pltpu.MemorySpace.VMEM),  # w_cat
                pl.BlockSpec(memory_space=pltpu.MemorySpace.VMEM),  # bias_sum
            ],
            out_specs=pl.BlockSpec(memory_space=pltpu.MemorySpace.VMEM),
        )(x_flat, w_cat, bias_sum)
    else:
        # Batched path: tile batch with a parallel grid axis (feeds both TCs on
        # v7x); weights/bias stay whole-array resident across the grid.
        bp = ((b + TB - 1) // TB) * TB
        if bp != b:
            x_flat = jnp.pad(x_flat, ((0, bp - b), (0, 0)))
        out_padded = pl.pallas_call(
            kernel,
            out_shape=jax.ShapeDtypeStruct((bp, c_pad), jnp.float32),
            grid=(bp // TB,),
            in_specs=[
                pl.BlockSpec((TB, d), lambda i: (i, 0)),        # x: batch-tiled
                pl.BlockSpec((c_pad, gd), lambda i: (0, 0)),    # w_cat: resident
                pl.BlockSpec((1, c_pad), lambda i: (0, 0)),     # bias: resident
            ],
            out_specs=pl.BlockSpec((TB, c_pad), lambda i: (i, 0)),
            compiler_params=pltpu.CompilerParams(
                dimension_semantics=("parallel",)),
        )(x_flat, w_cat, bias_sum)
        out_padded = out_padded[:b]

    return out_padded[:, :NUM_CLASSES]


def _reference_grouped(x_nchw, group_nbits, w_cat_bf16, bias_sum):
    """Plain-JAX reference with the SAME grouping and casts as the kernel."""
    b = x_nchw.shape[0]
    x = x_nchw.reshape(b, -1).astype(jnp.float32)
    c_pad, gd = w_cat_bf16.shape
    d = gd // len(group_nbits)
    x_clip = jnp.clip(x, 0.0, 1.0)
    acc = jnp.zeros((b, c_pad), jnp.float32)
    for g, nb in enumerate(group_nbits):
        if nb > 0:
            lv = float((1 << nb) - 1)
            xq = jnp.round(x_clip * lv) * (1.0 / lv)
        else:
            xq = x
        acc = acc + jax.lax.dot_general(
            xq.astype(jnp.bfloat16), w_cat_bf16[:, g * d:(g + 1) * d],
            (((1,), (1,)), ((), ())),
            preferred_element_type=jnp.float32)
    return (acc + bias_sum)[:, :NUM_CLASSES]


def _reference_per_member_f32(x_nchw, nbits, w_members_f32, biases_f32):
    """Faithful per-member f32 forward (no bf16, no grouping) — looser cross-check."""
    b = x_nchw.shape[0]
    x = x_nchw.reshape(b, -1).astype(jnp.float32)
    c_pad = w_members_f32.shape[1]
    out = jnp.zeros((b, c_pad), jnp.float32)
    for m, nb in enumerate(nbits):
        if nb > 0:
            lv = float((1 << nb) - 1)
            xq = jnp.round(jnp.clip(x, 0.0, 1.0) * lv) * (1.0 / lv)
        else:
            xq = x
        out = out + xq @ w_members_f32[m].T + biases_f32[m][None, :]
    return out[:, :NUM_CLASSES]


if __name__ == "__main__":
    # models = ['FP', 'Q1', 'Q2', 'HT']  -> n_bits: 0 (identity), 1, 2, 1 (HT proxy)
    model_types = ["FP", "Q1", "Q2", "HT"]
    nbits_map = {"FP": 0, "Q1": 1, "Q2": 2, "HT": 1}
    nbits = tuple(nbits_map[t] for t in model_types)
    M = len(model_types)

    # Small CIFAR-like NCHW input (spec demo shape).
    B, C, H, W = 2, 3, 16, 16
    D = C * H * W

    key = jax.random.PRNGKey(0)
    kx, kw, kb, kx2 = jax.random.split(key, 4)
    x = jax.random.uniform(kx, (B, C, H, W), jnp.float32)             # pixels in [0, 1]
    w_members = 0.02 * jax.random.normal(kw, (M, C_PAD, D), jnp.float32)
    biases = 0.01 * jax.random.normal(kb, (M, C_PAD), jnp.float32)

    group_nbits, w_cat, bias_sum = pack_ensemble_params(nbits, w_members, biases)

    # --- small-batch (gridless) path -------------------------------------
    out = ensemble_forward(x, group_nbits, w_cat, bias_sum)
    out = jax.block_until_ready(out)
    assert out.shape == (B, NUM_CLASSES)

    ref_same = _reference_grouped(x, group_nbits, w_cat, bias_sum)
    assert jnp.allclose(out, ref_same, atol=2e-3, rtol=2e-3), "mismatch vs grouped reference"

    ref_f32 = _reference_per_member_f32(x, nbits, w_members, biases)
    assert jnp.allclose(out, ref_f32, atol=3e-2, rtol=3e-2), "mismatch vs per-member f32 reference"

    # --- batched (gridded, parallel over batch tiles) path ----------------
    B2 = 512
    x_big = jax.random.uniform(kx2, (B2, C, H, W), jnp.float32)
    out_big = ensemble_forward(x_big, group_nbits, w_cat, bias_sum)
    out_big = jax.block_until_ready(out_big)
    assert out_big.shape == (B2, NUM_CLASSES)

    ref_big = _reference_grouped(x_big, group_nbits, w_cat, bias_sum)
    assert jnp.allclose(out_big, ref_big, atol=2e-3, rtol=2e-3), "mismatch vs grouped reference (batched)"

    print("KERNEL_OK")
</pallas_src>

<mosaic_0001>
module attributes {stable_mosaic.version = 11 : i64} {
  func.func @kernel(%arg0: memref<2x768xf32, #tpu.memory_space<vmem>>, %arg1: memref<16x2304xbf16, #tpu.memory_space<vmem>>, %arg2: memref<1x16xf32, #tpu.memory_space<vmem>>, %arg3: memref<2x16xf32, #tpu.memory_space<vmem>>) attributes {dimension_semantics = [], scalar_prefetch = 0 : i64, scratch_operands = 0 : i64, tpu.core_type = #tpu.core_type<tc>} {
    %c0 = arith.constant 0 : index
    %c0_0 = arith.constant 0 : index
    %0 = vector.load %arg0[%c0, %c0_0] : memref<2x768xf32, #tpu.memory_space<vmem>>, vector<2x768xf32>
    %cst = arith.constant 0.000000e+00 : f32
    %cst_1 = arith.constant 1.000000e+00 : f32
    %1 = vector.broadcast %cst : f32 to vector<2x768xf32>
    %2 = arith.maximumf %1, %0 : vector<2x768xf32>
    %3 = vector.broadcast %cst_1 : f32 to vector<2x768xf32>
    %4 = arith.minimumf %3, %2 : vector<2x768xf32>
    %5 = arith.truncf %0 : vector<2x768xf32> to vector<2x768xbf16>
    %c0_2 = arith.constant 0 : index
    %c0_3 = arith.constant 0 : index
    %6 = vector.load %arg1[%c0_2, %c0_3] : memref<16x2304xbf16, #tpu.memory_space<vmem>>, vector<16x768xbf16>
    %cst_4 = arith.constant dense<0.000000e+00> : vector<2x16xf32>
    %7 = tpu.matmul %5, %6, %cst_4 {dimension_numbers = #tpu.dot_dimension_numbers<[1], [1], [0], [0], [0, 0, 1, 0], [], []>} : vector<2x768xbf16>, vector<16x768xbf16>, vector<2x16xf32> -> vector<2x16xf32>
    %cst_5 = arith.constant 1.000000e+00 : f32
    %8 = vector.broadcast %cst_5 : f32 to vector<2x768xf32>
    %9 = arith.mulf %4, %8 : vector<2x768xf32>
    %10 = math.roundeven %9 : vector<2x768xf32>
    %cst_6 = arith.constant 1.000000e+00 : f32
    %11 = vector.broadcast %cst_6 : f32 to vector<2x768xf32>
    %12 = arith.mulf %10, %11 : vector<2x768xf32>
    %13 = arith.truncf %12 : vector<2x768xf32> to vector<2x768xbf16>
    %c0_7 = arith.constant 0 : index
    %c768 = arith.constant 768 : index
    %14 = vector.load %arg1[%c0_7, %c768] : memref<16x2304xbf16, #tpu.memory_space<vmem>>, vector<16x768xbf16>
    %cst_8 = arith.constant dense<0.000000e+00> : vector<2x16xf32>
    %15 = tpu.matmul %13, %14, %cst_8 {dimension_numbers = #tpu.dot_dimension_numbers<[1], [1], [0], [0], [0, 0, 1, 0], [], []>} : vector<2x768xbf16>, vector<16x768xbf16>, vector<2x16xf32> -> vector<2x16xf32>
    %16 = arith.addf %7, %15 : vector<2x16xf32>
    %cst_9 = arith.constant 3.000000e+00 : f32
    %17 = vector.broadcast %cst_9 : f32 to vector<2x768xf32>
    %18 = arith.mulf %4, %17 : vector<2x768xf32>
    %19 = math.roundeven %18 : vector<2x768xf32>
    %cst_10 = arith.constant 0.333333343 : f32
    %20 = vector.broadcast %cst_10 : f32 to vector<2x768xf32>
    %21 = arith.mulf %19, %20 : vector<2x768xf32>
    %22 = arith.truncf %21 : vector<2x768xf32> to vector<2x768xbf16>
    %c0_11 = arith.constant 0 : index
    %c1536 = arith.constant 1536 : index
    %23 = vector.load %arg1[%c0_11, %c1536] : memref<16x2304xbf16, #tpu.memory_space<vmem>>, vector<16x768xbf16>
    %cst_12 = arith.constant dense<0.000000e+00> : vector<2x16xf32>
    %24 = tpu.matmul %22, %23, %cst_12 {dimension_numbers = #tpu.dot_dimension_numbers<[1], [1], [0], [0], [0, 0, 1, 0], [], []>} : vector<2x768xbf16>, vector<16x768xbf16>, vector<2x16xf32> -> vector<2x16xf32>
    %25 = arith.addf %16, %24 : vector<2x16xf32>
    %c0_13 = arith.constant 0 : index
    %c0_14 = arith.constant 0 : index
    %26 = vector.load %arg2[%c0_13, %c0_14] : memref<1x16xf32, #tpu.memory_space<vmem>>, vector<1x16xf32>
    %27 = vector.broadcast %26 : vector<1x16xf32> to vector<2x16xf32>
    %28 = arith.addf %25, %27 : vector<2x16xf32>
    %c0_15 = arith.constant 0 : index
    %c0_16 = arith.constant 0 : index
    %29 = vector.load %arg3[%c0_15, %c0_16] : memref<2x16xf32, #tpu.memory_space<vmem>>, vector<2x16xf32>
    tpu.vector_store %arg3[%c0_15, %c0_16], %28 {strides = array<i32>} : memref<2x16xf32, #tpu.memory_space<vmem>>, vector<2x16xf32>,
    return
  }
}

</mosaic_0001>

<bundles_post_ra>
// kernel: ensemble_forward.1
= control target key start
LH: loop header
LB: loop body
LE: loop exit
PB: predicated region body
PF: predicated region fallthrough
CT: control target
= control target key end

     0   :  { %8 = vsyncpa [#allocation3], 0  ;;  %s736_s0 = inlined_call_operand.vmem [shape: f32[2,768], index: 0, kind: input, shape index: {}]   ;;  %s737_s1 = inlined_call_operand.hbm [shape: bf16[16,2304], index: 1, kind: input, shape index: {}]   ;;  %s738_s2 = inlined_call_operand.vmem [shape: f32[1,16], index: 2, kind: input, shape index: {}]   ;;  %s739_s3 = inlined_call_operand.hbm [shape: f32[2,16], index: 3, kind: output, shape index: {}]  }
   0x1   :  { %9 = vsyncpa [#allocation4], 0  ;;  %s16_s14 = sshll.u32 %s737_s1, 4  ;;  %s661_s15 = smov [#allocation2]   ;;  %s17_s14 = int_to_ptr.hbm [resolvable:$true] %s16_s14 }
   0x2   :  { %s18_s16 = sshll.u32 %s661_s15, 4  ;;  %s662_s17 = smov 1152   ;;  %s19_s16 = int_to_ptr.vmem [resolvable:$true] %s18_s16 }
   0x3   :  { %s663_s18 = smov 72  }
   0x4   :  { %24 = dma.hbm_to_vmem [thread:$0]  %s17_s14, 2304, %s19_s16, [#allocation3], %s662_s17, %s662_s17, %s663_s18  }
   0x5   :  { %657 = dma.done.wait [#allocation3], 2304  }
   0x6   :  { %658 = vsyncadd [#allocation3], 4294964992  ;;  %v484_v0 = vld [vmem:[#allocation2 + $0x18] sm:$0xf]  ;;  %v563_v1 = vld [vmem:[#allocation2 + $0x5c] sm:$0xf0] }
   0x7   :  { %v560_v2 = vld [vmem:[#allocation2 + $0x1c] sm:$0xf]  ;;  %v485_v3 = vor.u32 %v563_v1, %v484_v0  ;;  %v486_v4 = vld [vmem:[#allocation2 + $0x60] sm:$0xf0]  ;;  %v492_v5 = vld [vmem:[#allocation2 + $0x20] sm:$0xf] }
   0x8   :  { %v564_v6 = vld [vmem:[#allocation2 + $0x64] sm:$0xf0]  ;;  %v489_v7 = vor.u32 %v560_v2, %v486_v4  ;;  %v561_v9 = vld [vmem:[#allocation2 + $0x24] sm:$0xf]  ;;  %v494_v10 = vld [vmem:[#allocation2 + $0x68] sm:$0xf0] }
   0x9   :  { %v493_v8 = vor.u32 %v564_v6, %v492_v5  ;;  %v32_v11 = vld [vmem:[%s736_s0] sm:$0xff]  ;;  %135 = vmatpush.bf16.xpose.msra.mxu0 %v485_v3  ;;  %v497_v12 = vor.u32 %v561_v9, %v494_v10  ;;  %v500_v14 = vld [vmem:[#allocation2 + $0x28] sm:$0xf]  ;;  %v565_v15 = vld [vmem:[#allocation2 + $0x6c] sm:$0xf0]  ;;  %s664_s23 = smov [#allocation5]  }
   0xa   :  { %v34_v13 = vmax.f32 %v32_v11, 0.0  ;;  %40 = vst [vmem:[#allocation1] ss:$4 sm:$0xff] %v32_v11  ;;  %148 = vmatpush.bf16.xpose.msra.mxu1 %v489_v7  ;;  %v562_v16 = vld [vmem:[#allocation2 + $0x2c] sm:$0xf]  ;;  %v501_v19 = vor.u32 %v565_v15, %v500_v14  ;;  %s470_s24 = sshll.u32 %s664_s23, 4  ;;  %s471_s24 = int_to_ptr.vmem [resolvable:$true] %s470_s24 }
   0xb   :  { %161 = vmatpush.bf16.xpose.msra.mxu2 %v493_v8  ;;  %v502_v17 = vld [vmem:[#allocation2 + $0x70] sm:$0xf0]  ;;  %174 = vmatpush.bf16.xpose.msra.mxu3 %v497_v12  ;;  %v508_v21 = vld [vmem:[#allocation2] sm:$0xf]  ;;  %v557_v22 = vld [vmem:[#allocation2 + $0x44] sm:$0xf0] }
   0xc   :  { %v36_v18 = vmin.f32 %v34_v13, 1.0  ;;  %v505_v20 = vor.u32 %v562_v16, %v502_v17  ;;  %v509_v23 = vor.u32 %v557_v22, %v508_v21  ;;  %v554_v24 = vld [vmem:[#allocation2 + $0x4] sm:$0xf]  ;;  %v510_v25 = vld [vmem:[#allocation2 + $0x48] sm:$0xf0]  ;;  %s472_s27 = sshll.u32 %s739_s3, 4  ;;  %s473_s27 = int_to_ptr.hbm [resolvable:$true] %s472_s27 }
   0xd   :  { %v33_v26 = vld [vmem:[%s736_s0 + $0x8] sm:$0xf]  ;;  %v513_v29 = vor.u32 %v554_v24, %v510_v25  ;;  %v516_v61 = vld [vmem:[#allocation2 + $0x8] sm:$0xf]  ;;  %v558_v62 = vld [vmem:[#allocation2 + $0x4c] sm:$0xf0] }
   0xe   :  { %v574_v27 = vcvt.f32.s32 %v36_v18  ;;  %v314_v28 = vmul.f32 3.0, %v36_v18  ;;  %42 = vst [vmem:[#allocation1 + $0x20] ss:$4 sm:$0xff] %v33_v26  ;;  %v35_v30 = vmax.f32 %v33_v26, 0.0  ;;  %v572_v31 = vand.u32 2147483647, %v36_v18 }
   0xf   :  { %v577_v34 = vand.u32 2147483648, %v36_v18  ;;  %v555_v1 = vld [vmem:[#allocation2 + $0xc] sm:$0xf]  ;;  %v518_v3 = vld [vmem:[#allocation2 + $0x50] sm:$0xf0]  ;;  %v517_v14 = vor.u32 %v558_v62, %v516_v61  ;;  %vm463_vm4 = vcmask 123904  }
  0x10   :  { %v575_v32 = vcvt.s32.f32 %v574_v27  ;;  %v590_v33 = vcvt.f32.s32 %v314_v28  ;;  %v588_v38 = vand.u32 2147483647, %v314_v28  ;;  %v593_v39 = vand.u32 2147483648, %v314_v28  ;;  %v524_v4 = vld [vmem:[#allocation2 + $0x10] sm:$0xf] }
  0x11   :  { %187 = vmatpush.bf16.xpose.msrb.mxu0 %v501_v19  ;;  %v694_v36 = vld.sshfl [vmem:[#allocation1] sm:$0xff pattern:$0x73625140]  ;;  %v37_v40 = vmin.f32 %v35_v30, 1.0  ;;  %vm573_vm0 = vcmp.lt.f32.partialorder %v572_v31, 8388608.0 }
  0x12   :  { %200 = vmatpush.bf16.xpose.msrb.mxu1 %v505_v20  ;;  %v591_v35 = vcvt.s32.f32 %v590_v33  ;;  %v576_v37 = vand.u32 2147483647, %v575_v32  ;;  %v696_v41 = vld.sshfl [vmem:[#allocation1 + $0x8] sm:$0xff pattern:$0x73625140]  ;;  %vm702_vm1 = vcmp.lt.f32.partialorder %v588_v38, 8388608.0  ;;  %v521_v20 = vor.u32 %v555_v1, %v518_v3 }
  0x13   :  { %243 = vmatpush.bf16.xpose.msrb.mxu2 %v509_v23  ;;  %256 = vmatpush.bf16.xpose.msrb.mxu3 %v513_v29  ;;  %v698_v43 = vld.sshfl [vmem:[#allocation1 + $0x10] sm:$0xff pattern:$0x73625140]  ;;  %v700_v44 = vld.sshfl [vmem:[#allocation1 + $0x18] sm:$0xff pattern:$0x73625140]  ;;  %v582_v46 = vcvt.f32.s32 %v37_v40 }
  0x14   :  { %v592_v42 = vand.u32 2147483647, %v591_v35  ;;  %v578_v45 = vor.u32 %v577_v34, %v576_v37  ;;  %v580_v48 = vand.u32 2147483647, %v37_v40  ;;  %v315_v49 = vmul.f32 3.0, %v37_v40 }
  0x15   :  { %v583_v52 = vcvt.s32.f32 %v582_v46  ;;  %v585_v53 = vand.u32 2147483648, %v37_v40  ;;  %v708_v58 = vld.sshfl [vmem:[#allocation1 + $0x20] sm:$0xff pattern:$0x73625140]  ;;  %v556_v10 = vld [vmem:[#allocation2 + $0x14] sm:$0xf] }
  0x16   :  { %v594_v47 = vor.u32 %v593_v39, %v592_v42  ;;  %v579_v50 = vsel %vm573_vm0, %v578_v45, %v36_v18  ;;  %v598_v54 = vcvt.f32.s32 %v315_v49  ;;  %v596_v56 = vand.u32 2147483647, %v315_v49  ;;  %v710_v63 = vld.sshfl [vmem:[#allocation1 + $0x28] sm:$0xff pattern:$0x73625140] }
  0x17   :  { %71 = vst [vmem:[#allocation1] ss:$4 sm:$0xff] %v579_v50  ;;  %v584_v55 = vand.u32 2147483647, %v583_v52  ;;  %vm581_vm2 = vcmp.lt.f32.partialorder %v580_v48, 8388608.0  ;;  %v601_v60 = vand.u32 2147483648, %v315_v49  ;;  %v55_v39 = vpack.c.bf16 %v694_v36, %v694_v36 }
  0x18   :  { %v595_v57 = vsel %vm702_vm1, %v594_v47, %v314_v28  ;;  %v599_v59 = vcvt.s32.f32 %v598_v54  ;;  %vm712_vm3 = vcmp.lt.f32.partialorder %v596_v56, 8388608.0  ;;  %v559_v8 = vld [vmem:[#allocation2 + $0x54] sm:$0xf0]  ;;  %v526_v11 = vld [vmem:[#allocation2 + $0x58] sm:$0xf0]  ;;  %v57_v36 = vpack.c.bf16 %v698_v43, %v698_v43 }
  0x19   :  { %v586_v0 = vor.u32 %v585_v53, %v584_v55  ;;  %v318_v5 = vmul.f32 0.33333334, %v595_v57  ;;  %v525_v23 = vor.u32 %v559_v8, %v524_v4  ;;  %v529_v24 = vor.u32 %v556_v10, %v526_v11  ;;  %v532_v28 = vld [vmem:[#allocation2 + $0x30] sm:$0xf]  ;;  %v569_v29 = vld [vmem:[#allocation2 + $0x74] sm:$0xf0] }
  0x1a   :  { %v600_v2 = vand.u32 2147483647, %v599_v59  ;;  %v566_v30 = vld [vmem:[#allocation2 + $0x34] sm:$0xf]  ;;  %v534_v31 = vld [vmem:[#allocation2 + $0x78] sm:$0xf0]  ;;  %v533_v42 = vor.u32 %v569_v29, %v532_v28  ;;  %v59_v52 = vpack.c.bf16 %v708_v58, %v708_v58  ;;  %v60_v53 = vpack.c.bf16 %v710_v63, %v710_v63 }
  0x1b   :  { %v587_v6 = vsel %vm581_vm2, %v586_v0, %v37_v40  ;;  %v540_v32 = vld [vmem:[#allocation2 + $0x38] sm:$0xf]  ;;  %v570_v35 = vld [vmem:[#allocation2 + $0x7c] sm:$0xf0]  ;;  %v567_v37 = vld [vmem:[#allocation2 + $0x3c] sm:$0xf]  ;;  %v56_v40 = vpack.c.bf16 %v696_v41, %v696_v41  ;;  %v537_v45 = vor.u32 %v566_v30, %v534_v31  ;;  %v58_v41 = vpack.c.bf16 %v700_v44, %v700_v44 }
  0x1c   :  { %73 = vst [vmem:[#allocation1 + $0x20] ss:$4 sm:$0xff] %v587_v6  ;;  %v602_v9 = vor.u32 %v601_v60, %v600_v2  ;;  %v542_v38 = vld [vmem:[#allocation2 + $0x80] sm:$0xf0]  ;;  %v541_v46 = vor.u32 %v570_v35, %v540_v32  ;;  %v548_v48 = vld [vmem:[#allocation2 + $0x40] sm:$0xf] }
  0x1d   :  { %v545_v47 = vor.u32 %v567_v37, %v542_v38  ;;  %v568_v50 = vld [vmem:[#allocation2 + $0x44] sm:$0xf]  ;;  %v550_v51 = vld [vmem:[#allocation2 + $0x88] sm:$0xf0] }
  0x1e   :  { %v74_v12 = vld.sshfl [vmem:[#allocation1] sm:$0xff pattern:$0x73625140]  ;;  %v75_v13 = vld.sshfl [vmem:[#allocation1 + $0x8] sm:$0xff pattern:$0x73625140]  ;;  %v603_v19 = vsel %vm712_vm3, %v602_v9, %v315_v49  ;;  %v553_v55 = vor.u32 %v568_v50, %v550_v51 }
  0x1f   :  { %v86_v15 = vpack.c.bf16 %v74_v12, %v74_v12  ;;  %v87_v16 = vpack.c.bf16 %v75_v13, %v75_v13  ;;  %v76_v17 = vld.sshfl [vmem:[#allocation1 + $0x10] sm:$0xff pattern:$0x73625140]  ;;  %v77_v18 = vld.sshfl [vmem:[#allocation1 + $0x18] sm:$0xff pattern:$0x73625140] }
  0x20   :  { %v88_v21 = vpack.c.bf16 %v76_v17, %v76_v17  ;;  %v89_v22 = vpack.c.bf16 %v77_v18, %v77_v18  ;;  %322 = vst [vmem:[#allocation1] ss:$4 sm:$0xff] %v318_v5  ;;  %v319_v25 = vmul.f32 0.33333334, %v603_v19  ;;  %v571_v49 = vld [vmem:[#allocation2 + $0x84] sm:$0xf0] }
  0x21   :  { %136 = vmatmul.bf16.vlgmr.msra.gmra.mxu0 %v86_v15  ;;  %149 = vmatmul.bf16.vlgmr.msra.gmra.mxu1 %v87_v16  ;;  %v549_v54 = vor.u32 %v571_v49, %v548_v48 }
  0x22   :  { %162 = vmatmul.bf16.vlgmr.msra.gmra.mxu2 %v88_v21  ;;  %175 = vmatmul.bf16.vlgmr.msra.gmra.mxu3 %v89_v22 }
  0x23   :  { %269 = vmatpush.bf16.xpose.msra.mxu0 %v517_v14  ;;  %282 = vmatpush.bf16.xpose.msra.mxu1 %v521_v20  ;;  %v78_v26 = vld.sshfl [vmem:[#allocation1 + $0x20] sm:$0xff pattern:$0x73625140]  ;;  %v79_v27 = vld.sshfl [vmem:[#allocation1 + $0x28] sm:$0xff pattern:$0x73625140] }
  0x24   :  { %295 = vmatpush.bf16.xpose.msra.mxu2 %v525_v23  ;;  %308 = vmatpush.bf16.xpose.msra.mxu3 %v529_v24  ;;  %324 = vst [vmem:[#allocation1 + $0x20] ss:$4 sm:$0xff] %v319_v25  ;;  %v90_v33 = vpack.c.bf16 %v78_v26, %v78_v26  ;;  %v91_v34 = vpack.c.bf16 %v79_v27, %v79_v27 }
  0x27   :  { %v325_v56 = vld.sshfl [vmem:[#allocation1] sm:$0xff pattern:$0x73625140]  ;;  %v326_v57 = vld.sshfl [vmem:[#allocation1 + $0x8] sm:$0xff pattern:$0x73625140] }
  0x28   :  { %v327_v43 = vld.sshfl [vmem:[#allocation1 + $0x10] sm:$0xff pattern:$0x73625140]  ;;  %v328_v59 = vld.sshfl [vmem:[#allocation1 + $0x18] sm:$0xff pattern:$0x73625140]  ;;  %v337_v60 = vpack.c.bf16 %v325_v56, %v325_v56  ;;  %v338_v44 = vpack.c.bf16 %v326_v57, %v326_v57 }
  0x29   :  { %v339_v61 = vpack.c.bf16 %v327_v43, %v327_v43  ;;  %v340_v62 = vpack.c.bf16 %v328_v59, %v328_v59 }
  0x2b   :  { %v329_v58 = vld.sshfl [vmem:[#allocation1 + $0x20] sm:$0xff pattern:$0x73625140]  ;;  %v330_v63 = vld.sshfl [vmem:[#allocation1 + $0x28] sm:$0xff pattern:$0x73625140] }
  0x2c   :  { %v341_v0 = vpack.c.bf16 %v329_v58, %v329_v58  ;;  %v342_v1 = vpack.c.bf16 %v330_v63, %v330_v63 }
  0x31   :  { %188 = vmatmul.bf16.vlgmr.msrb.gmra.mxu0 %v90_v33  ;;  %201 = vmatmul.bf16.vlgmr.msrb.gmra.mxu1 %v91_v34 }
  0x32   :  { %244 = vmatmul.bf16.vlgmr.msrb.gmra.mxu2 %v55_v39  ;;  %257 = vmatmul.bf16.vlgmr.msrb.gmra.mxu3 %v56_v40 }
  0x33   :  { %386 = vmatpush.bf16.xpose.msrb.mxu0 %v533_v42  ;;  %399 = vmatpush.bf16.xpose.msrb.mxu1 %v537_v45 }
  0x34   :  { %412 = vmatpush.bf16.xpose.msrb.mxu2 %v541_v46  ;;  %425 = vmatpush.bf16.xpose.msrb.mxu3 %v545_v47 }
  0x41   :  { %270 = vmatmul.bf16.vlgmr.msra.gmra.mxu0 %v57_v36  ;;  %283 = vmatmul.bf16.vlgmr.msra.gmra.mxu1 %v58_v41 }
  0x42   :  { %296 = vmatmul.bf16.vlgmr.msra.gmra.mxu2 %v59_v52  ;;  %309 = vmatmul.bf16.vlgmr.msra.gmra.mxu3 %v60_v53 }
  0x43   :  { %438 = vmatpush.bf16.xpose.msra.mxu0 %v549_v54  ;;  %451 = vmatpush.bf16.xpose.msra.mxu1 %v553_v55  ;;  %v608_v54 = vld [vmem:[%s738_s2] ss:$0 sm:$0xff] }
  0x51   :  { %387 = vmatmul.bf16.vlgmr.msrb.gmra.mxu0 %v337_v60  ;;  %400 = vmatmul.bf16.vlgmr.msrb.gmra.mxu1 %v338_v44 }
  0x52   :  { %413 = vmatmul.bf16.vlgmr.msrb.gmra.mxu2 %v339_v61  ;;  %426 = vmatmul.bf16.vlgmr.msrb.gmra.mxu3 %v340_v62 }
  0x61   :  { %439 = vmatmul.bf16.vlgmr.msra.gmra.mxu0 %v341_v0  ;;  %452 = vmatmul.bf16.vlgmr.msra.gmra.mxu1 %v342_v1 }
  0x9e   :  { %v137_v2 = vpop.f32.mrf.mxu0  ;;  %v150_v3 = vpop.f32.mrf.mxu1 }
  0x9f   :  { %v151_v20 = vadd.f32 %v150_v3, %v137_v2 }
  0xa5   :  { %v163_v4 = vpop.f32.mrf.mxu2  ;;  %v176_v5 = vpop.f32.mrf.mxu3 }
  0xa6   :  { %v139_v6 = vpop.f32.mrf.mxu0  ;;  %v152_v7 = vpop.f32.mrf.mxu1  ;;  %v164_v21 = vadd.f32 %v163_v4, %v151_v20 }
  0xa8   :  { %v177_v26 = vadd.f32 %v176_v5, %v164_v21 }
  0xad   :  { %v165_v8 = vpop.f32.mrf.mxu2  ;;  %v178_v9 = vpop.f32.mrf.mxu3 }
  0xae   :  { %v189_v10 = vpop.f32.mrf.mxu0  ;;  %v202_v11 = vpop.f32.mrf.mxu1 }
  0xaf   :  { %v190_v27 = vadd.f32 %v189_v10, %v177_v26 }
  0xb1   :  { %v203_v32 = vadd.f32 %v202_v11, %v190_v27 }
  0xb5   :  { %v245_v12 = vpop.f32.mrf.mxu2  ;;  %v258_v13 = vpop.f32.mrf.mxu3 }
  0xb6   :  { %v191_v14 = vpop.f32.mrf.mxu0  ;;  %v204_v15 = vpop.f32.mrf.mxu1  ;;  %v246_v33 = vadd.f32 %v245_v12, %v203_v32 }
  0xb8   :  { %v259_v34 = vadd.f32 %v258_v13, %v246_v33 }
  0xbd   :  { %v247_v16 = vpop.f32.mrf.mxu2  ;;  %v260_v17 = vpop.f32.mrf.mxu3 }
  0xbe   :  { %v271_v18 = vpop.f32.mrf.mxu0  ;;  %v284_v19 = vpop.f32.mrf.mxu1 }
  0xbf   :  { %v272_v40 = vadd.f32 %v271_v18, %v259_v34 }
  0xc1   :  { %v285_v46 = vadd.f32 %v284_v19, %v272_v40 }
  0xc5   :  { %v297_v22 = vpop.f32.mrf.mxu2  ;;  %v310_v23 = vpop.f32.mrf.mxu3 }
  0xc6   :  { %v273_v24 = vpop.f32.mrf.mxu0  ;;  %v286_v25 = vpop.f32.mrf.mxu1  ;;  %v298_v47 = vadd.f32 %v297_v22, %v285_v46 }
  0xc8   :  { %v311_v52 = vadd.f32 %v310_v23, %v298_v47 }
  0xcd   :  { %v299_v28 = vpop.f32.mrf.mxu2  ;;  %v312_v29 = vpop.f32.mrf.mxu3 }
  0xce   :  { %v388_v30 = vpop.f32.mrf.mxu0  ;;  %v401_v31 = vpop.f32.mrf.mxu1 }
  0xcf   :  { %v402_v42 = vadd.f32 %v401_v31, %v388_v30 }
  0xd5   :  { %v414_v35 = vpop.f32.mrf.mxu2  ;;  %v427_v37 = vpop.f32.mrf.mxu3 }
  0xd6   :  { %v390_v38 = vpop.f32.mrf.mxu0  ;;  %v403_v39 = vpop.f32.mrf.mxu1  ;;  %v415_v45 = vadd.f32 %v414_v35, %v402_v42 }
  0xd8   :  { %v428_v48 = vadd.f32 %v427_v37, %v415_v45 }
  0xdd   :  { %v416_v49 = vpop.f32.mrf.mxu2  ;;  %v429_v50 = vpop.f32.mrf.mxu3 }
  0xde   :  { %v440_v51 = vpop.f32.mrf.mxu0  ;;  %v453_v36 = vpop.f32.mrf.mxu1 }
  0xdf   :  { %v441_v41 = vadd.f32 %v440_v51, %v428_v48 }
  0xe1   :  { %v454_v53 = vadd.f32 %v453_v36, %v441_v41 }
  0xe3   :  { %v457_v55 = vadd.f32 %v454_v53, %v311_v52 }
  0xe5   :  { %v462_v56 = vadd.f32 %v608_v54, %v457_v55 }
  0xe6   :  { %v442_v57 = vpop.f32.mrf.mxu0  ;;  %v455_v43 = vpop.f32.mrf.mxu1 }
  0xe7   :  { %464 = vst.msk [vmem:[#allocation5] sm:$0x3] %vm463_vm4, %v462_v56 }
  0xe8   :  { %475 = dma.vmem_to_hbm [thread:$0]  %s471_s24, 32, %s473_s27, [#allocation4]  }
  0xe9   :  { %659 = dma.done.wait [#allocation4], 32  }
  0xea   :  { %660 = vsyncadd [#allocation4], 4294967264 }
  0xeb   :  { %480 = vsyncpa [#allocation3], 1 }
  0xec   :  { %481 = vsyncpa [#allocation4], 1 }

</bundles_post_ra>
